<compile_context>
chip_gen: v7x
topology: tpu7x:2x2x1
jax: 0.10.0
libtpu: 0.0.40
codegen_flags: <defaults>
</compile_context>

<pallas_src>
import functools

import jax
import jax.numpy as jnp
from jax import lax
from jax.experimental import pallas as pl
from jax.experimental.pallas import tpu as pltpu

_LANE = 128
_SUBLANE = 8
_CHUNK_ROWS = 512  # inner-loop compute chunk (256 KiB f32 per operand)


def _partial_sqdiff_kernel(x_ref, t_ref, psum_ref, *, rows_valid, row_tile,
                           chunk_rows, mask_needed):
    """Per-grid-block partial sum of squared differences -> (8, 128)."""
    n_chunks = row_tile // chunk_rows
    block_row0 = pl.program_id(0) * row_tile

    def chunk_sum(c, acc):
        r0 = c * chunk_rows
        if not isinstance(r0, int):
            r0 = pl.multiple_of(r0, chunk_rows)
        xc = x_ref[pl.ds(r0, chunk_rows), :].astype(jnp.float32)
        tc = t_ref[pl.ds(r0, chunk_rows), :].astype(jnp.float32)
        d = xc - tc
        sq = d * d
        if mask_needed:
            # Global row index of each element; rows >= rows_valid are
            # edge-block padding with unspecified contents -> zero them.
            ridx = (block_row0 + r0
                    + lax.broadcasted_iota(jnp.int32, (chunk_rows, _LANE), 0))
            sq = jnp.where(ridx < rows_valid, sq, 0.0)
        # (chunk_rows, 128) -> (chunk_rows//8, 8, 128); reducing the leading
        # axis is just VPU vreg adds (no scalar / XLU path in the hot loop).
        return acc + jnp.sum(
            sq.reshape(chunk_rows // _SUBLANE, _SUBLANE, _LANE), axis=0)

    acc0 = jnp.zeros((_SUBLANE, _LANE), jnp.float32)
    if n_chunks == 1:
        psum_ref[...] = chunk_sum(0, acc0)
    else:
        psum_ref[...] = lax.fori_loop(0, n_chunks, chunk_sum, acc0)


def _generation_budget():
    """(max_tile_rows, vmem_limit_bytes) sized to the local chip's VMEM."""
    vmem_cap = 64 * 1024 * 1024  # conservative default (v7x per-TC)
    try:
        info = pltpu.get_tpu_info()
        cap = getattr(info, "vmem_capacity_bytes", None)
        if cap:
            vmem_cap = int(cap)
    except Exception:
        pass
    if vmem_cap >= 96 * 1024 * 1024:
        # v5e / v6e (128 MiB VMEM): 8 MiB f32 input tiles, 32 MiB double-buffered.
        return 16384, 80 * 1024 * 1024
    # v7x (64 MiB VMEM): 4 MiB tiles, leave headroom for internal scratch.
    return 8192, 40 * 1024 * 1024


def _pick_row_tile(rows_full, max_tile_rows, chunk_rows=_CHUNK_ROWS):
    """Pick (row_tile, chunk_rows). rows_full >= 8 is guaranteed by the caller."""
    rt = min(max_tile_rows, (rows_full // _SUBLANE) * _SUBLANE)
    # Ensure >= 2 grid blocks once there's enough work so v7x's two
    # TensorCores both get a share ("parallel" axis); costs ~nothing on
    # single-TC v5e/v6e (one extra ~0.35 us grid step).
    if rows_full >= 4 * chunk_rows:
        half = -(-rows_full // 2)
        half = ((half + _SUBLANE - 1) // _SUBLANE) * _SUBLANE
        rt = min(rt, half)
    if rt >= chunk_rows:
        rt = (rt // chunk_rows) * chunk_rows  # multiple of the inner chunk
        cr = chunk_rows
    else:
        cr = rt  # single chunk covers the whole (small) tile
    return rt, cr


def _mse_loss_pallas(x, target):
    n = x.size
    rows_full = n // _LANE
    # Contiguous reshapes are free (no HBM copy), unlike pad / slice.
    x2 = x.reshape(rows_full, _LANE)
    t2 = target.reshape(rows_full, _LANE)

    max_tile_rows, vmem_limit = _generation_budget()
    row_tile, chunk_rows = _pick_row_tile(rows_full, max_tile_rows)
    num_blocks = -(-rows_full // row_tile)
    mask_needed = (rows_full % row_tile) != 0

    kernel = functools.partial(
        _partial_sqdiff_kernel,
        rows_valid=rows_full,
        row_tile=row_tile,
        chunk_rows=chunk_rows,
        mask_needed=mask_needed,
    )

    bytes_in = n * (x2.dtype.itemsize + t2.dtype.itemsize)
    bytes_out = num_blocks * _SUBLANE * _LANE * 4

    partials = pl.pallas_call(
        kernel,
        out_shape=jax.ShapeDtypeStruct((num_blocks * _SUBLANE, _LANE),
                                       jnp.float32),
        grid_spec=pltpu.PrefetchScalarGridSpec(
            num_scalar_prefetch=0,
            grid=(num_blocks,),
            in_specs=[
                pl.BlockSpec((row_tile, _LANE), lambda i: (i, 0)),
                pl.BlockSpec((row_tile, _LANE), lambda i: (i, 0)),
            ],
            out_specs=pl.BlockSpec((_SUBLANE, _LANE), lambda i: (i, 0)),
        ),
        compiler_params=pltpu.CompilerParams(
            # Each grid step writes its own output block -> no carry, so the
            # axis can be sharded across TensorCores (v7x megacore).
            dimension_semantics=("parallel",),
            vmem_limit_bytes=vmem_limit,
        ),
        cost_estimate=pl.CostEstimate(
            flops=3 * n, transcendentals=0,
            bytes_accessed=bytes_in + bytes_out),
    )(x2, t2)

    return jnp.sum(partials) / jnp.float32(n)


def content_loss_forward(x, target, *, min_pallas_elems=1 << 20,
                         force_pallas=False):
    """ContentLoss.forward: returns (input passed through unchanged, mse_loss).

    If `target` is a constant (as in the PyTorch module), callers can cache it
    in bfloat16 and pass it here directly; the kernel upcasts to f32 per chunk,
    cutting the target's HBM read traffic in half.
    """
    assert x.shape == target.shape, "input and target must match (as in mse_loss)"
    n = x.size
    rows_full = n // _LANE

    use_pallas = (force_pallas or n >= min_pallas_elems)
    if (not use_pallas) or (n % _LANE != 0) or (rows_full < _SUBLANE):
        # Small-input fast path and non-128-divisible fallback: a fused XLA
        # elementwise+reduce already reads exactly 2N bytes (HBM roofline) and
        # avoids any pad/slice copies or custom-call launch overhead.
        d = x.astype(jnp.float32) - target.astype(jnp.float32)
        loss = jnp.mean(d * d)
    else:
        loss = _mse_loss_pallas(x, target)

    # Identity pass-through: hand the caller's array back directly (no kernel
    # HBM writeback needed).
    # TODO(synk): `self.loss` module state / autograd `.detach()` have no
    # Pallas equivalent; the loss is simply returned alongside x.
    return x, loss


if __name__ == "__main__":
    key = jax.random.PRNGKey(0)
    k1, k2, k3, k4, k5, k6 = jax.random.split(key, 6)

    def ref_mse(a, b):
        d = a.astype(jnp.float32) - b.astype(jnp.float32)
        return jnp.mean(d * d)

    # 1) Default path on a small NCHW feature map: batch=2, channels=4, 16x16.
    shape = (2, 4, 16, 16)
    x = jax.random.normal(k1, shape, dtype=jnp.float32)
    target = jax.random.normal(k2, shape, dtype=jnp.float32)  # "detached" constant
    out, loss = content_loss_forward(x, target)
    out = jax.block_until_ready(out)
    loss = jax.block_until_ready(loss)
    assert out.shape == x.shape and jnp.allclose(out, x), "pass-through mismatch"
    assert jnp.allclose(loss, ref_mse(x, target), rtol=1e-5, atol=1e-6), "mse mismatch (fast path)"

    # 2) Force the Pallas kernel on the same 128-aligned shape (no tail mask).
    out, loss = content_loss_forward(x, target, force_pallas=True)
    out = jax.block_until_ready(out)
    loss = jax.block_until_ready(loss)
    assert jnp.allclose(out, x), "pass-through mismatch (pallas)"
    assert jnp.allclose(loss, ref_mse(x, target), rtol=1e-5, atol=1e-6), "mse mismatch (pallas)"

    # 3) Force the Pallas kernel where rows % row_tile != 0 -> exercises the
    #    in-kernel edge-block masking (2*4*16*20 = 2560 elems = 20 rows of 128).
    shape3 = (2, 4, 16, 20)
    x3 = jax.random.normal(k3, shape3, dtype=jnp.float32)
    t3 = jax.random.normal(k4, shape3, dtype=jnp.float32)
    out3, loss3 = content_loss_forward(x3, t3, force_pallas=True)
    out3 = jax.block_until_ready(out3)
    loss3 = jax.block_until_ready(loss3)
    assert jnp.allclose(out3, x3), "pass-through mismatch (masked)"
    assert jnp.allclose(loss3, ref_mse(x3, t3), rtol=1e-5, atol=1e-6), "mse mismatch (masked)"

    # 4) bf16 inputs (e.g. a target cached in bf16 to halve its HBM reads).
    xb = jax.random.normal(k5, shape, dtype=jnp.float32).astype(jnp.bfloat16)
    tb = jax.random.normal(k6, shape, dtype=jnp.float32).astype(jnp.bfloat16)
    outb, lossb = content_loss_forward(xb, tb, force_pallas=True)
    outb = jax.block_until_ready(outb)
    lossb = jax.block_until_ready(lossb)
    assert jnp.allclose(outb, xb), "pass-through mismatch (bf16)"
    assert jnp.allclose(lossb, ref_mse(xb, tb), rtol=1e-4, atol=1e-5), "mse mismatch (bf16)"

    print("KERNEL_OK")
</pallas_src>

<mosaic_0001>
module attributes {stable_mosaic.version = 11 : i64} {
  func.func @_partial_sqdiff_kernel(%arg0: i32, %arg1: memref<16x128xf32, #tpu.memory_space<vmem>>, %arg2: memref<16x128xf32, #tpu.memory_space<vmem>>, %arg3: memref<8x128xf32, #tpu.memory_space<vmem>>) attributes {dimension_semantics = [#tpu.dimension_semantics<parallel>], iteration_bounds = array<i64: 1>, scalar_prefetch = 0 : i64, scratch_operands = 0 : i64, tpu.core_type = #tpu.core_type<tc>, window_params = [{transform_indices = @transform_0, window_bounds = array<i64: 16, 128>}, {transform_indices = @transform_1, window_bounds = array<i64: 16, 128>}, {transform_indices = @transform_2, window_bounds = array<i64: 8, 128>}]} {
    %cst = arith.constant 0.000000e+00 : f32
    %0 = vector.broadcast %cst : f32 to vector<8x128xf32>
    %c0 = arith.constant 0 : index
    %c0_0 = arith.constant 0 : index
    %1 = vector.load %arg1[%c0, %c0_0] : memref<16x128xf32, #tpu.memory_space<vmem>>, vector<16x128xf32>
    %c0_1 = arith.constant 0 : index
    %c0_2 = arith.constant 0 : index
    %2 = vector.load %arg2[%c0_1, %c0_2] : memref<16x128xf32, #tpu.memory_space<vmem>>, vector<16x128xf32>
    %3 = arith.subf %1, %2 : vector<16x128xf32>
    %4 = arith.mulf %3, %3 : vector<16x128xf32>
    %5 = vector.shape_cast %4 : vector<16x128xf32> to vector<2x8x128xf32>
    %cst_3 = arith.constant dense<0.000000e+00> : vector<8x128xf32>
    %6 = vector.multi_reduction <add>, %5, %cst_3 [0] : vector<2x8x128xf32> to vector<8x128xf32>
    %7 = arith.addf %0, %6 : vector<8x128xf32>
    %c0_4 = arith.constant 0 : index
    %c0_5 = arith.constant 0 : index
    %8 = vector.load %arg3[%c0_4, %c0_5] : memref<8x128xf32, #tpu.memory_space<vmem>>, vector<8x128xf32>
    tpu.vector_store %arg3[%c0_4, %c0_5], %7 {strides = array<i32>} : memref<8x128xf32, #tpu.memory_space<vmem>>, vector<8x128xf32>,
    return
  }
  func.func @transform_0(%arg0: i32) -> (i32, i32) {
    %c0_i32 = arith.constant 0 : i32
    %c0_i32_0 = arith.constant 0 : i32
    return %arg0, %c0_i32 : i32, i32
  }
  func.func @transform_1(%arg0: i32) -> (i32, i32) {
    %c0_i32 = arith.constant 0 : i32
    %c0_i32_0 = arith.constant 0 : i32
    return %arg0, %c0_i32 : i32, i32
  }
  func.func @transform_2(%arg0: i32) -> (i32, i32) {
    %c0_i32 = arith.constant 0 : i32
    %c0_i32_0 = arith.constant 0 : i32
    return %arg0, %c0_i32 : i32, i32
  }
}

</mosaic_0001>

<bundles_post_ra>
// kernel: tpu_custom_call.1
= control target key start
LH: loop header
LB: loop body
LE: loop exit
PB: predicated region body
PF: predicated region fallthrough
CT: control target
= control target key end

     0   :  { %7 = vsyncpa [#allocation3], 0  ;;  %s200_s0 = inlined_call_operand.hbm [shape: f32[16,128], index: 0, kind: input, shape index: {}]   ;;  %s201_s1 = inlined_call_operand.hbm [shape: f32[16,128], index: 1, kind: input, shape index: {}]   ;;  %s202_s2 = inlined_call_operand.hbm [shape: f32[8,128], index: 2, kind: output, shape index: {}]  }
   0x1   :  { %8 = vsyncpa [#allocation6], 0 }
   0x2   :  { %9 = vsyncpa [#allocation4], 0  ;;  %s144_s9 = smov [#allocation2]   ;;  %s72_s13 = scalar_lea.hbm %s200_s0, 256 }
   0x3   :  { %s15_s10 = sshll.u32 %s144_s9, 4  ;;  %p73_p0 = scmp.ne.s32.totalorder %s200_s0, %s72_s13  ;;  %s16_s10 = int_to_ptr.vmem [resolvable:$true] %s15_s10 }
   0x4   :  { %p76_p1 = scmp.lt.u32.totalorder %s72_s13, %s200_s0 }
   0x6   :  { %p78_p2 = pnand %p76_p1, %p73_p0 }
   0x8   :  { %81 = shalt.err (!%p78_p2)
}
   0x9   :  { %s82_s18 = scalar_lea.vmem %s16_s10, 256  ;;  %p87_p4 = scmp.lt.s32.totalorder %s16_s10, %s16_s10 }
   0xa   :  { %p83_p3 = scmp.ne.s32.totalorder %s16_s10, %s82_s18  ;;  %p88_p5 = scmp.lt.s32.totalorder %s82_s18, %s82_s18 }
   0xc   :  { %p89_p6 = por %p88_p5, %p87_p4 }
   0xe   :  { %p90_p7 = pnand %p89_p6, %p83_p3 }
  0x10   :  { %93 = shalt.err (!%p90_p7)
}
  0x11   :  { %s145_s19 = smov 128   ;;  %s146_s20 = smov 8  }
  0x12   :  { %21 = dma.hbm_to_vmem [thread:$0]  %s200_s0, 256, %s16_s10, [#allocation3], %s145_s19, %s145_s19, %s146_s20  }
  0x13   :  { %s147_s23 = smov [#allocation5]   ;;  %s94_s27 = scalar_lea.hbm %s201_s1, 256 }
  0x14   :  { %s27_s24 = sshll.u32 %s147_s23, 4  ;;  %p95_p8 = scmp.ne.s32.totalorder %s201_s1, %s94_s27  ;;  %s28_s24 = int_to_ptr.vmem [resolvable:$true] %s27_s24 }
  0x15   :  { %p98_p9 = scmp.lt.u32.totalorder %s94_s27, %s201_s1 }
  0x17   :  { %p100_p10 = pnand %p98_p9, %p95_p8 }
  0x19   :  { %103 = shalt.err (!%p100_p10)
}
  0x1a   :  { %s104_s4 = scalar_lea.vmem %s28_s24, 256  ;;  %p109_p12 = scmp.lt.s32.totalorder %s28_s24, %s28_s24 }
  0x1b   :  { %p105_p11 = scmp.ne.s32.totalorder %s28_s24, %s104_s4  ;;  %p110_p13 = scmp.lt.s32.totalorder %s104_s4, %s104_s4 }
  0x1d   :  { %p111_p0 = por %p110_p13, %p109_p12 }
  0x1f   :  { %p112_p1 = pnand %p111_p0, %p105_p11 }
  0x21   :  { %115 = shalt.err (!%p112_p1)
}
  0x22   :  { %33 = dma.hbm_to_vmem [thread:$0]  %s201_s1, 256, %s28_s24, [#allocation6], %s145_s19, %s145_s19, %s146_s20  }
  0x23   :  { %138 = dma.done.wait [#allocation3], 256  }
  0x24   :  { %139 = vsyncadd [#allocation3], 4294967040 }
  0x25   :  { %140 = dma.done.wait [#allocation6], 256  }
  0x26   :  { %141 = vsyncadd [#allocation6], 4294967040  ;;  %v40_v0 = vld [vmem:[#allocation2] sm:$0xff]  ;;  %v41_v1 = vld [vmem:[#allocation2 + $0x8] sm:$0xff]  ;;  %s148_s6 = smov [#allocation7]  }
  0x27   :  { %v42_v2 = vld [vmem:[#allocation5] sm:$0xff]  ;;  %v43_v3 = vld [vmem:[#allocation5 + $0x8] sm:$0xff]  ;;  %s57_s7 = sshll.u32 %s148_s6, 4  ;;  %s58_s7 = int_to_ptr.vmem [resolvable:$true] %s57_s7 }
  0x28   :  { %v44_v4 = vsub.f32 %v40_v0, %v42_v2  ;;  %v45_v5 = vsub.f32 %v41_v1, %v43_v3  ;;  %s116_s8 = scalar_lea.vmem %s58_s7, 128  ;;  %p121_p3 = scmp.lt.s32.totalorder %s58_s7, %s58_s7 }
  0x29   :  { %p117_p2 = scmp.ne.s32.totalorder %s58_s7, %s116_s8  ;;  %p122_p4 = scmp.lt.s32.totalorder %s116_s8, %s116_s8 }
  0x2a   :  { %v46_v6 = vmul.f32 %v44_v4, %v44_v4  ;;  %v47_v7 = vmul.f32 %v45_v5, %v45_v5 }
  0x2b   :  { %p123_p5 = por %p122_p4, %p121_p3 }
  0x2c   :  { %v48_v8 = vadd.f32 %v47_v7, %v46_v6 }
  0x2d   :  { %p124_p6 = pnand %p123_p5, %p117_p2 }
  0x2e   :  { %50 = vst [vmem:[#allocation7] sm:$0xff] %v48_v8 }
  0x2f   :  { %127 = shalt.err (!%p124_p6)
}
  0x30   :  { %s128_s10 = scalar_lea.hbm %s202_s2, 128 }
  0x31   :  { %p129_p7 = scmp.ne.s32.totalorder %s202_s2, %s128_s10  ;;  %p132_p8 = scmp.lt.u32.totalorder %s128_s10, %s202_s2 }
  0x33   :  { %p134_p9 = pnand %p132_p8, %p129_p7 }
  0x35   :  { %137 = shalt.err (!%p134_p9)
}
  0x36   :  { %60 = dma.vmem_to_hbm [thread:$0]  %s58_s7, 128, %s202_s2, [#allocation4]  }
  0x37   :  { %142 = dma.done.wait [#allocation4], 128  }
  0x38   :  { %143 = vsyncadd [#allocation4], 4294967168 }
  0x39   :  { %64 = vsyncpa [#allocation3], 1 }
  0x3a   :  { %65 = vsyncpa [#allocation6], 1 }
  0x3b   :  { %66 = vsyncpa [#allocation4], 1 }

</bundles_post_ra>
